<compile_context>
chip_gen: v6e
topology: v6e:2x2x1
jax: 0.10.0
libtpu: 0.0.40
codegen_flags: <defaults>
</compile_context>

<pallas_src>
import jax
import jax.numpy as jnp
from jax.experimental import pallas as pl
from jax.experimental.pallas import tpu as pltpu

LANES = 128        # vreg lane width
TILE_ROWS = 8192   # 8192 x 128 f32 = 4 MiB/tile; 2x(in+out) = 16 MiB, needs 32 MiB scoped VMEM
MIN_GRID = 4       # aim for >= 4 grid tiles so v7x megacore (2 TCs) always has >= 2 each


def linear_kernel(w_ref, b_ref, x_ref, o_ref):
    # Pure VPU fused multiply-add on a lane-dense (tb, 128) tile.
    w = w_ref[0, 0]            # scalar weight from SMEM
    b = b_ref[0, 0]            # scalar bias from SMEM
    o_ref[...] = x_ref[...] * w + b


def _round_up(a, m):
    return ((a + m - 1) // m) * m


def linear_forward(x, weight, bias, *, tile_rows=TILE_ROWS):
    """Forward of torch.nn.Linear(1, 1): y = x @ W^T + b.

    x: (B, 1); weight: (1, 1); bias: (1,).  Returns (B, 1).
    """
    B, in_f = x.shape
    out_f = weight.shape[0]
    assert in_f == 1 and out_f == 1, "kernel specialised for Linear(1, 1)"

    itemsize = jnp.dtype(x.dtype).itemsize
    assert itemsize in (1, 2, 4), "unsupported dtype for this kernel"
    sublanes = (8 * 4) // itemsize     # 8 for f32, 16 for bf16, 32 for 8-bit

    n = B
    rows = pl.cdiv(n, LANES)           # number of 128-lane rows needed
    padded = rows * LANES

    # Copy-free path when B is already a multiple of 128: the reshape is pure
    # metadata and no pad/slice copies are emitted.
    x_flat = x.reshape(-1)
    if padded != n:
        x_flat = jnp.pad(x_flat, (0, padded - n))
    x2d = x_flat.reshape(rows, LANES)  # lane-dense input slab

    # Tile-row selection:
    #  - tiny inputs: one block equal to the full array (exempt from the
    #    (sublane, 128) divisibility rule), grid = 1.
    #  - otherwise: cap at TILE_ROWS but also split into >= MIN_GRID tiles so
    #    both v7x TensorCores get work; last partial block is masked by Pallas.
    if rows <= sublanes:
        tb = rows
    else:
        tb = min(tile_rows, _round_up(pl.cdiv(rows, MIN_GRID), sublanes))
    grid = pl.cdiv(rows, tb)

    w2d = weight.reshape(1, 1).astype(x.dtype)
    b2d = bias.reshape(1, 1).astype(x.dtype)

    y2d = pl.pallas_call(
        linear_kernel,
        out_shape=jax.ShapeDtypeStruct((rows, LANES), x.dtype),
        grid=(grid,),
        in_specs=[
            pl.BlockSpec(memory_space=pltpu.MemorySpace.SMEM),  # weight scalar
            pl.BlockSpec(memory_space=pltpu.MemorySpace.SMEM),  # bias scalar
            # NOTE: pipeline_mode=pl.Buffered(3) on this spec is an optional
            # few-percent v7x tweak per the review ("keep only if measured win");
            # default 2-deep pipelining is used here.
            pl.BlockSpec((tb, LANES), lambda i: (i, 0)),        # lane-dense x tile
        ],
        out_specs=pl.BlockSpec((tb, LANES), lambda i: (i, 0)),  # lane-dense y tile
        compiler_params=pltpu.CompilerParams(
            # Batch tiles are independent -> shard across TCs on v7x megacore.
            dimension_semantics=("parallel",),
            # 16 MiB of double-buffered tiles + Mosaic scratch; needed on v5e
            # (16 MiB scoped default), harmless on v6e/v7x.
            vmem_limit_bytes=32 << 20,
        ),
    )(w2d, b2d, x2d)

    # Drop padding (only if any) and restore the (B, 1) Linear output shape.
    y_flat = y2d.reshape(-1)
    if padded != n:
        y_flat = y_flat[:n]
    return y_flat.reshape(B, out_f)


if __name__ == "__main__":
    key = jax.random.PRNGKey(0)
    k_w, k_b, k_x, k_x2, k_x3 = jax.random.split(key, 5)

    # Same parameter shapes as torch.nn.Linear(1, 1): weight (1,1), bias (1,).
    weight = jax.random.uniform(k_w, (1, 1), jnp.float32, minval=-1.0, maxval=1.0)
    bias = jax.random.uniform(k_b, (1,), jnp.float32, minval=-1.0, maxval=1.0)

    def reference(x):
        return x @ weight.T + bias

    # 1) Small batch with in_features=1, including the spec's [[4.0]] example row.
    x_small = jnp.concatenate(
        [jnp.array([[4.0]], jnp.float32),
         jax.random.normal(k_x, (1, 1), jnp.float32)],
        axis=0,
    )  # (2, 1)
    y_small = linear_forward(x_small, weight, bias)
    jax.block_until_ready(y_small)
    assert y_small.shape == (2, 1)
    assert jnp.allclose(y_small, reference(x_small), atol=1e-5)

    # 2) 128-aligned batch: exercises the copy-free (no pad / no slice) path
    #    and a multi-tile grid (rows=32 -> 4 tiles of 8x128).
    x_aligned = jax.random.normal(k_x2, (4096, 1), jnp.float32)
    y_aligned = linear_forward(x_aligned, weight, bias)
    jax.block_until_ready(y_aligned)
    assert y_aligned.shape == (4096, 1)
    assert jnp.allclose(y_aligned, reference(x_aligned), atol=1e-5)

    # 3) Unaligned batch: exercises the masked/padded path.
    x_ragged = jax.random.normal(k_x3, (300, 1), jnp.float32)
    y_ragged = linear_forward(x_ragged, weight, bias)
    jax.block_until_ready(y_ragged)
    assert y_ragged.shape == (300, 1)
    assert jnp.allclose(y_ragged, reference(x_ragged), atol=1e-5)

    print("KERNEL_OK")
</pallas_src>

<mosaic_0001>
module attributes {stable_mosaic.version = 11 : i64} {
  func.func @linear_kernel(%arg0: i32, %arg1: memref<1x1xf32, #tpu.memory_space<smem>>, %arg2: memref<1x1xf32, #tpu.memory_space<smem>>, %arg3: memref<1x128xf32, #tpu.memory_space<vmem>>, %arg4: memref<1x128xf32, #tpu.memory_space<vmem>>) attributes {dimension_semantics = [#tpu.dimension_semantics<parallel>], iteration_bounds = array<i64: 1>, scalar_prefetch = 0 : i64, scratch_operands = 0 : i64, tpu.core_type = #tpu.core_type<tc>, window_params = [{transform_indices = @transform_0, window_bounds = array<i64: 1, 1>}, {transform_indices = @transform_1, window_bounds = array<i64: 1, 1>}, {transform_indices = @transform_2, window_bounds = array<i64: 1, 128>}, {transform_indices = @transform_3, window_bounds = array<i64: 1, 128>}]} {
    %c0 = arith.constant 0 : index
    %c0_0 = arith.constant 0 : index
    %0 = memref.load %arg1[%c0, %c0_0] : memref<1x1xf32, #tpu.memory_space<smem>>
    %c0_1 = arith.constant 0 : index
    %c0_2 = arith.constant 0 : index
    %1 = memref.load %arg2[%c0_1, %c0_2] : memref<1x1xf32, #tpu.memory_space<smem>>
    %c0_3 = arith.constant 0 : index
    %c0_4 = arith.constant 0 : index
    %2 = vector.load %arg3[%c0_3, %c0_4] : memref<1x128xf32, #tpu.memory_space<vmem>>, vector<1x128xf32>
    %3 = vector.broadcast %0 : f32 to vector<1x128xf32>
    %4 = arith.mulf %2, %3 : vector<1x128xf32>
    %5 = vector.broadcast %1 : f32 to vector<1x128xf32>
    %6 = arith.addf %4, %5 : vector<1x128xf32>
    %c0_5 = arith.constant 0 : index
    %c0_6 = arith.constant 0 : index
    %7 = vector.load %arg4[%c0_5, %c0_6] : memref<1x128xf32, #tpu.memory_space<vmem>>, vector<1x128xf32>
    tpu.vector_store %arg4[%c0_5, %c0_6], %6 {strides = array<i32>} : memref<1x128xf32, #tpu.memory_space<vmem>>, vector<1x128xf32>,
    return
  }
  func.func @transform_0(%arg0: i32) -> (i32, i32) {
    %c0_i32 = arith.constant 0 : i32
    %c0_i32_0 = arith.constant 0 : i32
    %c0_i32_1 = arith.constant 0 : i32
    return %c0_i32, %c0_i32_0 : i32, i32
  }
  func.func @transform_1(%arg0: i32) -> (i32, i32) {
    %c0_i32 = arith.constant 0 : i32
    %c0_i32_0 = arith.constant 0 : i32
    %c0_i32_1 = arith.constant 0 : i32
    return %c0_i32, %c0_i32_0 : i32, i32
  }
  func.func @transform_2(%arg0: i32) -> (i32, i32) {
    %c0_i32 = arith.constant 0 : i32
    %c0_i32_0 = arith.constant 0 : i32
    return %arg0, %c0_i32 : i32, i32
  }
  func.func @transform_3(%arg0: i32) -> (i32, i32) {
    %c0_i32 = arith.constant 0 : i32
    %c0_i32_0 = arith.constant 0 : i32
    return %arg0, %c0_i32 : i32, i32
  }
}

</mosaic_0001>

<bundles_post_ra>
// kernel: tpu_custom_call.1
= control target key start
LH: loop header
LB: loop body
LE: loop exit
PB: predicated region body
PF: predicated region fallthrough
CT: control target
= control target key end

     0   :  { %s95_s0 = inlined_call_operand.<no memory space> [shape: f32[1,1], index: 0, kind: input, shape index: {}]   ;;  %s96_s1 = inlined_call_operand.<no memory space> [shape: f32[1,1], index: 1, kind: input, shape index: {}]   ;;  %s97_s2 = inlined_call_operand.vmem [shape: f32[1,128], index: 2, kind: input, shape index: {}]   ;;  %s98_s3 = inlined_call_operand.hbm [shape: f32[1,128], index: 3, kind: output, shape index: {}]  }
   0x1   :  { %v19_v0 = vld [vmem:[%s97_s2] sm:$0x1]  ;;  %v20_v1 = vstv %s95_s0  ;;  %v22_v2 = vstv %s96_s1 }
   0x2   :  { %10 = vsyncpa [#allocation5], 0  ;;  %v21_v3 = vmul.f32 %v20_v1, %v19_v0  ;;  %s62_s18 = smov [#allocation4]  }
   0x3   :  { %s31_s19 = sshll.u32 %s62_s18, 4  ;;  %s32_s19 = int_to_ptr.vmem [resolvable:$true] %s31_s19 }
   0x4   :  { %v23_v4 = vadd.f32 %v22_v2, %v21_v3  ;;  %s40_s20 = scalar_lea.vmem %s32_s19, 16  ;;  %s44_s21 = scalar_lea.vmem %s32_s19, 32 }
   0x5   :  { %p41_p0 = scmp.ne.s32.totalorder %s32_s19, %s40_s20  ;;  %p45_p1 = scmp.lt.s32.totalorder %s32_s19, %s32_s19 }
   0x6   :  { %24 = vst [vmem:[#allocation4] sm:$0x1] %v23_v4  ;;  %p46_p2 = scmp.lt.s32.totalorder %s44_s21, %s40_s20 }
   0x8   :  { %p47_p3 = por %p46_p2, %p45_p1 }
   0xa   :  { %p48_p4 = pnand %p47_p3, %p41_p0 }
   0xc   :  { %51 = shalt.err (!%p48_p4)
}
   0xd   :  { %34 = dma.vmem_to_hbm [thread:$0]  %s32_s19, 16, %s98_s3, [#allocation5]  }
   0xe   :  { %60 = dma.done.wait [#allocation5], 16  }
   0xf   :  { %61 = vsyncadd [#allocation5], 4294967280 }
  0x10   :  { %38 = vsyncpa [#allocation5], 1 }

</bundles_post_ra>
